<compile_context>
chip_gen: v5e
topology: v5e:2x2
jax: 0.10.0
libtpu: 0.0.40
codegen_flags: <defaults>
</compile_context>

<pallas_src>
import jax
import jax.numpy as jnp
from jax.experimental import pallas as pl
from jax.experimental.pallas import tpu as pltpu


def shortcut_kernel(x1_ref, x2_ref, w_ref, bias_ref, o_ref):
    # x1_ref:   (C_in,  TL)   -- leading batch dim squeezed by BlockSpec
    # x2_ref:   (C_out, TL)
    # w_ref:    (C_out, C_in) -- BN scale already folded in
    # bias_ref: (C_out, 1)    -- folded BN bias (f32)
    # o_ref:    (C_out, TL)
    y = jnp.dot(w_ref[...], x1_ref[...], preferred_element_type=jnp.float32)  # MXU, f32 acc
    y = y + bias_ref[...]                     # folded BN bias (broadcast over lanes)
    y = y + x2_ref[...].astype(jnp.float32)   # skip connection
    o_ref[...] = jnp.maximum(y, 0.0).astype(o_ref.dtype)


def _choose_l_tile(L):
    # Lane-dense tile in the 128..1024 range (kept modest so it also fits v7x's 64 MiB VMEM
    # with double buffering); fall back to full L when it doesn't divide evenly.
    for tl in (1024, 512, 256, 128):
        if L % tl == 0:
            return tl
    return L


def shortcut_layer(x1, x2, weight, gamma, beta, running_mean, running_var, eps=1e-5):
    """relu(BN(Conv1d_1x1(x1)) + x2), BN in inference mode with running stats."""
    N, C_in, L = x1.shape
    C_out = weight.shape[0]
    assert x2.shape == (N, C_out, L)

    # Fold BatchNorm into the (tiny) weight + a per-channel bias -- done once, outside the kernel.
    scale = (gamma / jnp.sqrt(running_var + eps)).astype(jnp.float32)          # (C_out,)
    w_scaled = (weight.astype(jnp.float32) * scale[:, None]).astype(x1.dtype)  # (C_out, C_in)
    bias = (beta.astype(jnp.float32) - running_mean.astype(jnp.float32) * scale)
    bias = bias.reshape(C_out, 1)                                              # (C_out, 1) f32

    TL = _choose_l_tile(L)
    n_l_tiles = L // TL

    grid_spec = pltpu.PrefetchScalarGridSpec(
        num_scalar_prefetch=0,
        grid=(N, n_l_tiles),
        in_specs=[
            # Leading size-1 batch dim squeezed (None) so the kernel sees 2-D lane-dense refs.
            pl.BlockSpec((None, C_in, TL), lambda n, l: (n, 0, l)),
            pl.BlockSpec((None, C_out, TL), lambda n, l: (n, 0, l)),
            # Weight / bias stay resident across the whole grid (constant index_map).
            pl.BlockSpec((C_out, C_in), lambda n, l: (0, 0)),
            pl.BlockSpec((C_out, 1), lambda n, l: (0, 0)),
        ],
        out_specs=pl.BlockSpec((None, C_out, TL), lambda n, l: (n, 0, l)),
    )

    # Size scoped VMEM from the actual blocks (double-buffered streams + resident weight/bias),
    # with headroom; clamp to sane bounds so it works on v5e/v6e (128 MiB) and v7x (64 MiB).
    itemsize = jnp.dtype(x1.dtype).itemsize
    stream_bytes = (C_in * TL + 2 * C_out * TL) * itemsize         # x1 + x2 + out per step
    resident_bytes = C_out * C_in * itemsize + C_out * 4
    vmem_limit = 2 * stream_bytes + resident_bytes + (4 << 20)     # 2x for double buffering
    vmem_limit = int(min(max(vmem_limit, 16 << 20), 64 << 20))

    return pl.pallas_call(
        shortcut_kernel,
        out_shape=jax.ShapeDtypeStruct((N, C_out, L), x1.dtype),
        grid_spec=grid_spec,
        compiler_params=pltpu.CompilerParams(
            dimension_semantics=("parallel", "parallel"),
            vmem_limit_bytes=vmem_limit,
        ),
    )(x1, x2, w_scaled, bias)


def shortcut_layer_ref(x1, x2, weight, gamma, beta, running_mean, running_var, eps=1e-5):
    y = jnp.einsum("oc,ncl->nol", weight.astype(jnp.float32), x1.astype(jnp.float32))
    y = (y - running_mean[None, :, None]) / jnp.sqrt(running_var[None, :, None] + eps)
    y = y * gamma[None, :, None] + beta[None, :, None]
    return jnp.maximum(y + x2.astype(jnp.float32), 0.0)


if __name__ == "__main__":
    key = jax.random.PRNGKey(0)
    k1, k2, k3, k4, k5, k6, k7 = jax.random.split(key, 7)

    N, C_in, C_out, L = 2, 4, 8, 16

    x1 = jax.random.normal(k1, (N, C_in, L), dtype=jnp.float32)
    x2 = jax.random.normal(k2, (N, C_out, L), dtype=jnp.float32)

    # Conv1d(in_channels, out_channels, kernel_size=1, bias=False): weight (C_out, C_in, 1) -> (C_out, C_in)
    weight = jax.random.normal(k3, (C_out, C_in), dtype=jnp.float32) * 0.1
    # BatchNorm1d(out_channels) parameters / running stats (deterministic, nontrivial)
    gamma = 1.0 + 0.1 * jax.random.normal(k4, (C_out,), dtype=jnp.float32)
    beta = 0.1 * jax.random.normal(k5, (C_out,), dtype=jnp.float32)
    running_mean = 0.05 * jax.random.normal(k6, (C_out,), dtype=jnp.float32)
    running_var = 1.0 + 0.1 * jax.nn.softplus(jax.random.normal(k7, (C_out,), dtype=jnp.float32))

    out = shortcut_layer(x1, x2, weight, gamma, beta, running_mean, running_var)
    out = jax.block_until_ready(out)

    ref = shortcut_layer_ref(x1, x2, weight, gamma, beta, running_mean, running_var)
    assert out.shape == (N, C_out, L)
    assert jnp.allclose(out, ref, atol=1e-4, rtol=1e-4), "mismatch vs JAX reference"

    print("KERNEL_OK")
</pallas_src>

<mosaic_0001>
module attributes {stable_mosaic.version = 11 : i64} {
  func.func @shortcut_kernel(%arg0: i32, %arg1: i32, %arg2: memref<1x4x16xf32, #tpu.memory_space<vmem>>, %arg3: memref<1x8x16xf32, #tpu.memory_space<vmem>>, %arg4: memref<8x4xf32, #tpu.memory_space<vmem>>, %arg5: memref<8x1xf32, #tpu.memory_space<vmem>>, %arg6: memref<1x8x16xf32, #tpu.memory_space<vmem>>) attributes {dimension_semantics = [#tpu.dimension_semantics<parallel>, #tpu.dimension_semantics<parallel>], iteration_bounds = array<i64: 2, 1>, scalar_prefetch = 0 : i64, scratch_operands = 0 : i64, tpu.core_type = #tpu.core_type<tc>, window_params = [{transform_indices = @transform_0, window_bounds = array<i64: 1, 4, 16>}, {transform_indices = @transform_1, window_bounds = array<i64: 1, 8, 16>}, {pipeline_mode = #tpu.pipeline_mode<synchronous>, transform_indices = @transform_2, window_bounds = array<i64: 8, 4>}, {pipeline_mode = #tpu.pipeline_mode<synchronous>, transform_indices = @transform_3, window_bounds = array<i64: 8, 1>}, {transform_indices = @transform_4, window_bounds = array<i64: 1, 8, 16>}]} {
    %c0 = arith.constant 0 : index
    %c0_0 = arith.constant 0 : index
    %0 = vector.load %arg4[%c0, %c0_0] : memref<8x4xf32, #tpu.memory_space<vmem>>, vector<8x4xf32>
    %c0_1 = arith.constant 0 : index
    %c0_2 = arith.constant 0 : index
    %c0_3 = arith.constant 0 : index
    %1 = vector.load %arg2[%c0_1, %c0_2, %c0_3] : memref<1x4x16xf32, #tpu.memory_space<vmem>>, vector<1x4x16xf32>
    %2 = vector.shape_cast %1 : vector<1x4x16xf32> to vector<4x16xf32>
    %cst = arith.constant dense<0.000000e+00> : vector<8x16xf32>
    %3 = tpu.matmul %0, %2, %cst {dimension_numbers = #tpu.dot_dimension_numbers<[1], [0], [0], [1], [0, 0, 1, 1], [], []>} : vector<8x4xf32>, vector<4x16xf32>, vector<8x16xf32> -> vector<8x16xf32>
    %c0_4 = arith.constant 0 : index
    %c0_5 = arith.constant 0 : index
    %4 = vector.load %arg5[%c0_4, %c0_5] : memref<8x1xf32, #tpu.memory_space<vmem>>, vector<8x1xf32>
    %5 = vector.broadcast %4 : vector<8x1xf32> to vector<8x16xf32>
    %6 = arith.addf %3, %5 : vector<8x16xf32>
    %c0_6 = arith.constant 0 : index
    %c0_7 = arith.constant 0 : index
    %c0_8 = arith.constant 0 : index
    %7 = vector.load %arg3[%c0_6, %c0_7, %c0_8] : memref<1x8x16xf32, #tpu.memory_space<vmem>>, vector<1x8x16xf32>
    %8 = vector.shape_cast %7 : vector<1x8x16xf32> to vector<8x16xf32>
    %9 = arith.addf %6, %8 : vector<8x16xf32>
    %cst_9 = arith.constant 0.000000e+00 : f32
    %10 = vector.broadcast %cst_9 : f32 to vector<8x16xf32>
    %11 = arith.maximumf %9, %10 : vector<8x16xf32>
    %c0_10 = arith.constant 0 : index
    %c0_11 = arith.constant 0 : index
    %c0_12 = arith.constant 0 : index
    %12 = vector.load %arg6[%c0_10, %c0_11, %c0_12] : memref<1x8x16xf32, #tpu.memory_space<vmem>>, vector<1x8x16xf32>
    %13 = vector.shape_cast %12 : vector<1x8x16xf32> to vector<8x16xf32>
    %14 = vector.shape_cast %11 : vector<8x16xf32> to vector<1x8x16xf32>
    tpu.vector_store %arg6[%c0_10, %c0_11, %c0_12], %14 {strides = array<i32>} : memref<1x8x16xf32, #tpu.memory_space<vmem>>, vector<1x8x16xf32>,
    return
  }
  func.func @transform_0(%arg0: i32, %arg1: i32) -> (i32, i32, i32) {
    %c0_i32 = arith.constant 0 : i32
    %c0_i32_0 = arith.constant 0 : i32
    return %arg0, %c0_i32, %arg1 : i32, i32, i32
  }
  func.func @transform_1(%arg0: i32, %arg1: i32) -> (i32, i32, i32) {
    %c0_i32 = arith.constant 0 : i32
    %c0_i32_0 = arith.constant 0 : i32
    return %arg0, %c0_i32, %arg1 : i32, i32, i32
  }
  func.func @transform_2(%arg0: i32, %arg1: i32) -> (i32, i32) {
    %c0_i32 = arith.constant 0 : i32
    %c0_i32_0 = arith.constant 0 : i32
    %c0_i32_1 = arith.constant 0 : i32
    return %c0_i32, %c0_i32_0 : i32, i32
  }
  func.func @transform_3(%arg0: i32, %arg1: i32) -> (i32, i32) {
    %c0_i32 = arith.constant 0 : i32
    %c0_i32_0 = arith.constant 0 : i32
    %c0_i32_1 = arith.constant 0 : i32
    return %c0_i32, %c0_i32_0 : i32, i32
  }
  func.func @transform_4(%arg0: i32, %arg1: i32) -> (i32, i32, i32) {
    %c0_i32 = arith.constant 0 : i32
    %c0_i32_0 = arith.constant 0 : i32
    return %arg0, %c0_i32, %arg1 : i32, i32, i32
  }
}

</mosaic_0001>

<bundles_post_ra>
// kernel: tpu_custom_call.1
= control target key start
LH: loop header
LB: loop body
LE: loop exit
PB: predicated region body
PF: predicated region fallthrough
CT: control target
= control target key end

     0   :  { %9 = vsyncpa [#allocation3], 0  ;;  %s765_s0 = inlined_call_operand.hbm [shape: f32[2,4,16], index: 0, kind: input, shape index: {}]   ;;  %s766_s1 = inlined_call_operand.vmem [shape: f32[2,8,16], index: 1, kind: input, shape index: {}]   ;;  %s767_s2 = inlined_call_operand.vmem [shape: f32[8,4], index: 2, kind: input, shape index: {}]   ;;  %s768_s3 = inlined_call_operand.vmem [shape: f32[8,1], index: 3, kind: input, shape index: {}]   ;;  %s769_s4 = inlined_call_operand.hbm [shape: f32[2,8,16], index: 4, kind: output, shape index: {}]  }
   0x1   :  { %11 = vsyncpa [#allocation3 + $0x1], 0 }
   0x2   :  { %12 = vsyncpa [#allocation4], 0 }
   0x3   :  { %14 = vsyncpa [#allocation4 + $0x1], 0  ;;  %s633_s15 = smov 0   ;;  %s635_s16 = smov 0  }
   0x4   :  { %s637_s17 = smov 0   ;;  %s639_s18 = smov 0  }
   0x5   :  { %s641_s19 = smov 0   ;;  %s643_s20 = smov 0  }
   0x6 LB: > { %s413_s21 = sadd.s32 4294967295, %s605_s20   ;;  %s414_s22 = sadd.s32 4294967294, %s605_s20   ;;  %s605_s20 = sphi %s643_s20, %s20_s20   ;;  %s601_s19 = sphi %s641_s19, %s778_s19   ;;  %s597_s18 = sphi %s639_s18, %s777_s18   ;;  %s593_s17 = sphi %s637_s17, %s776_s17   ;;  %s589_s16 = sphi %s635_s16, %s775_s16   ;;  %s585_s15 = sphi %s633_s15, %s774_s15  }
   0x7   : > { %s32_s23 = sadd.s32 1, %s601_s19  ;;  %s41_s24 = sadd.s32 1, %s593_s17 }
   0x8   : > { %p34_p0 = scmp.ge.s32.totalorder %s32_s23, 2  ;;  %p48_p1 = scmp.ne.s32.totalorder %s593_s17, %s589_s16 }
   0x9   : > { %p49_p2 = scmp.eq.s32.totalorder %s605_s20, 0  ;;  %p54_p3 = scmp.ne.s32.totalorder %s589_s16, %s585_s15 }
   0xa   : > { %s780_s23 = smov (%p34_p0, %s32_s23), 0  ;;  %p55_p5 = scmp.eq.s32.totalorder %s413_s21, 0 }
   0xb   : > { %p674_p4 = por %p49_p2, %p48_p1  ;;  %s36_s26 = ssub.s32 %s601_s19, %s780_s23 }
   0xc   : > { %p150_p6 = scmp.eq.s32.totalorder %s413_s21, 1  ;;  %p39_p7 = scmp.eq.s32.totalorder %s36_s26, 0 }
   0xd   : > { %p680_p8 = por %p55_p5, %p54_p3  ;;  %p156_p10 = scmp.eq.s32.totalorder %s414_s22, 1 }
   0xe   : > { %p684_p9 = por %p150_p6, %p48_p1  ;;  %p416_p12 = scmp.ge.s32.totalorder %s605_s20, 2 }
   0xf   : > { %s689_s29 = scalar_select %p39_p7, %s593_s17, %s41_s24  }
  0x10   : > { %p691_p11 = por %p156_p10, %p54_p3  ;;  %p441_p13 = scmp.lt.s32.totalorder %s605_s20, 2 }
  0x11   : > { %s182_s5 = sand.u32 1, %s593_s17   ;;  %s418_s7 = sshll.u32 %s601_s19, 2 }
  0x12   : > { %s417_s6 = sshll.u32 %s182_s5, 2  ;;  %s191_s10 = scalar_lea.hbm %s765_s0, %s418_s7 }
  0x13   : > { %s186_s11 = scalar_lea.vmem [#allocation2], %s417_s6  ;;  %s193_s13 = sshll.u32 %s191_s10, 4  ;;  %s194_s13 = int_to_ptr.hbm [resolvable:$true] %s193_s13 }
  0x14   : > { %s195_s12 = sshll.u32 %s186_s11, 4  ;;  %p434_p0 = pnand %p441_p13, %p674_p4  ;;  %s196_s12 = int_to_ptr.vmem [resolvable:$true] %s195_s12 }
  0x15   : > { %p419_p1 = scmp.ge.s32.totalorder %s605_s20, 1  ;;  %p210_p2 = scmp.lt.s32.totalorder %s605_s20, 3 }
  0x16   : > { %s183_s14 = scalar_lea.sflag [#allocation3], %s182_s5 }
  0x17   : > { %436 = dma.hbm_to_vmem [thread:$0]  (!%p434_p0), %s194_s13, 64, %s196_s12, %s183_s14  }
  0x18   : > { %p211_p3 = pnand %p419_p1, %p210_p2 }
  0x19   : > { %s707_s21 = sand.u32 (!%p211_p3), 1, %s589_s16  }
  0x1a   : > { %214 = sbr.rel (%p211_p3) target bundleno = 169 (0xa9), region = 36  ;;  %s420_s22 = sshll.u32 (!%p211_p3), %s707_s21, 2 }
  0x1b   : > { %s217_s24 = scalar_lea.sflag (!%p211_p3), [#allocation3], %s707_s21  ;;  %s220_s26 = scalar_lea.vmem (!%p211_p3), [#allocation2], %s420_s22 }
  0x1f   : > { %576 = dma.done.wait (%p680_p8), %s217_s24, 64  }
  0x20   : > { %578 = vsyncadd (%p680_p8), %s217_s24, 4294967232  ;;  %v607_v0 = vmov 0   ;;  %vm272_vm0 = vcmask 1043456   ;;  %vm268_vm1 = vcmask 31744   ;;  %v261_v1 = vld [vmem:[%s220_s26] sm:$0xf] }
  0x21   : > { %492 = vset.pattern.permute.xlu0 %v607_v0  ;;  %v260_v2 = vld [vmem:[%s767_s2] sm:$0xff]  ;;  %423 = vmatpush.msk.msra.mxu0 %vm272_vm0, %v261_v1  ;;  %p253_p4 = scmp.lt.s32.totalorder %s597_s18, 1  ;;  %s421_s9 = sshll.u32 %s707_s21, 3  ;;  %vm299_vm2 = vcmask 130048  }
  0x22   : > { %v262_v3 = vld [vmem:[%s768_s3] sm:$0xff]  ;;  %424 = vmatmul.msk.f32.vlgmr.msra.gmra.mxu0 %vm268_vm1, %v260_v2  ;;  %s426_s10 = sshll.u32 %s597_s18, 3  ;;  %s252_s26 = scalar_lea.vmem [#allocation5], %s421_s9 }
  0x23   : > { %265 = vperm.xlu0 %492, %v262_v3   ;;  %s254_s27 = scalar_select %p253_p4, %s597_s18, 1 }
  0x24   : > { %s313_s24 = scalar_lea.hbm %s769_s4, %s426_s10  ;;  %s315_s25 = sshll.u32 %s252_s26, 4  ;;  %s316_s25 = int_to_ptr.vmem [resolvable:$true] %s315_s25 }
  0x25   : > { %s422_s8 = sshll.u32 %s254_s27, 3  ;;  %s317_s5 = sshll.u32 %s313_s24, 4  ;;  %s318_s5 = int_to_ptr.hbm [resolvable:$true] %s317_s5 }
  0x26   : > { %s259_s13 = scalar_lea.vmem %s766_s1, %s422_s8  ;;  %s302_s18 = scalar_lea.sflag [#allocation4], %s707_s21 }
  0x27   : > { %v296_v6 = vld [vmem:[%s259_s13] sm:$0xff]  ;;  %s537_s6 = sshra.s32 %s318_s5, 4  ;;  %s543_s9 = scalar_lea.hbm %s769_s4, 16  ;;  %s538_s6 = int_to_ptr.hbm [resolvable:$true] %s537_s6 }
  0x28   : > { %s539_s7 = scalar_lea.hbm %s538_s6, 8  ;;  %p544_p8 = scmp.lt.s32.totalorder %s538_s6, %s769_s4 }
  0x29   : > { %p540_p5 = scmp.ne.s32.totalorder %s538_s6, %s539_s7  ;;  %p545_p10 = scmp.lt.s32.totalorder %s543_s9, %s539_s7 }
  0x2b   : > { %p541_p6 = pnand %p540_p5, %p684_p9  ;;  %p546_p13 = por %p545_p10, %p544_p8 }
  0x2d   : > { %p542_p7 = pneg %p541_p6 }
  0x2f   : > { %p547_p0 = pnand %p546_p13, %p542_p7 }
  0x95   : > { %v266_v4 = vpop.permute.xlu0 %265 }
  0x9f   : > { %v293_v5 = vpop.f32.mrf.mxu0 }
  0xa0   : > { %v294_v7 = vadd.f32 %v293_v5, %v266_v4 }
  0xa2   : > { %v297_v8 = vadd.f32 %v296_v6, %v294_v7 }
  0xa4   : > { %v298_v9 = vmax.f32 %v297_v8, 0.0 }
  0xa6   : > { %300 = vst.msk [vmem:[%s252_s26] sm:$0xff] %vm299_vm2, %v298_v9 }
  0xa7   : > { %550 = shalt.err (!%p547_p0)
}
  0xa8   : > { %431 = dma.vmem_to_hbm [thread:$0]  (%p684_p9), %s316_s25, 128, %s318_s5, %s302_s18  }
  0xa9 PF: > { %s329_s21 = sand.u32 1, %s585_s15   ;;  %p438_p1 = pnand %p416_p12, %p691_p11 }
  0xaa   : > { %s330_s12 = scalar_lea.sflag [#allocation4], %s329_s21 }
  0xab   : > { %p439_p2 = pneg %p438_p1 }
  0xad   : > { %580 = dma.done.wait (%p439_p2), %s330_s12, 128  }
  0xae   : > { %582 = vsyncadd (%p439_p2), %s330_s12, 4294967168  ;;  %s20_s20 = sadd.s32 1, %s605_s20   ;;  %s774_s15 = smov %s589_s16 }
  0xaf   : > { %p17_p3 = scmp.ge.s32.totalorder %s20_s20, 4   ;;  %s775_s16 = smov %s593_s17 }
  0xb0   : > { %s776_s17 = smov %s689_s29  ;;  %s777_s18 = smov %s601_s19 }
  0xb1   : > { %s778_s19 = smov %s780_s23  ;;  %19 = sbr.rel (!%p17_p3) target bundleno = 6 (0x6), region = 84 }
  0xb6   :  { %336 = vsyncpa [#allocation3], 1 }
  0xb7   :  { %338 = vsyncpa [#allocation3 + $0x1], 1 }
  0xb8   :  { %339 = vsyncpa [#allocation4], 1 }
  0xb9   :  { %341 = vsyncpa [#allocation4 + $0x1], 1 }

</bundles_post_ra>
